<compile_context>
chip_gen: v6e
topology: v6e:2x2x1
jax: 0.10.0
libtpu: 0.0.40
codegen_flags: <defaults>
</compile_context>

<pallas_src>
import jax
import jax.numpy as jnp
from jax.experimental import pallas as pl
from jax.experimental.pallas import tpu as pltpu

_EPS = 1e-5


def _round_up(v, m):
    return ((v + m - 1) // m) * m


def _make_kernel(dims):
    (B, N, Cin, latent, c1, c2, fc, fcp, hp, k1, out_pad,
     gcol, r_c1, r_c2, R_BIAS, R_FC1, R_FC2, R_H1, R_H2) = dims
    f32 = jnp.float32
    inv_bn = 1.0 / float(B * N)
    inv_b = 1.0 / float(B)

    def kernel(x_ref, z_ref, p_ref, w_ref, out_ref):
        x = x_ref[...]                                           # (B, Cin, N) channel-first

        # 1x1 Conv1d + BN(train) + ReLU, batched over (B, C, N).
        # Conv bias is omitted: a per-channel constant shift cancels exactly under the
        # train-mode BN mean subtraction. Variance = E[x^2]-E[x]^2 so the two reductions
        # (sum, sumsq) have no serial dependence.
        def conv_bn_relu(inp, ci, co, row0):
            blk = p_ref[row0:row0 + co, :]                       # (co, PW)  [w | gamma | beta]
            acc = inp[:, 0:1, :] * blk[None, :, 0:1]             # (B, co, N)
            for c in range(1, ci):
                acc = acc + inp[:, c:c + 1, :] * blk[None, :, c:c + 1]
            s = jnp.sum(acc, axis=(0, 2), keepdims=True) * inv_bn        # (1, co, 1)
            ss = jnp.sum(acc * acc, axis=(0, 2), keepdims=True) * inv_bn
            var = ss - s * s
            g = blk[None, :, gcol:gcol + 1]
            b = blk[None, :, gcol + 1:gcol + 2]
            y = (acc - s) * jax.lax.rsqrt(var + _EPS) * g + b
            return jnp.maximum(y, 0.0)

        h = conv_bn_relu(x, Cin, c1, r_c1)                       # (B, c1, N)
        h = conv_bn_relu(h, c1, c2, r_c2)                        # (B, c2, N)

        # Global max-pool over points (batched), concat latent, zero-pad K to k1.
        pooled = jnp.max(h, axis=2)                              # (B, c2)
        z = z_ref[...]                                           # (B, latent)
        parts = [pooled, z]
        if k1 > c2 + latent:
            parts.append(jnp.zeros((B, k1 - c2 - latent), f32))
        tz = jnp.concatenate(parts, axis=1)                      # (B, k1)

        def bn_batch(v, grow):       # BatchNorm1d (train mode) over the batch axis
            s = jnp.sum(v, axis=0, keepdims=True) * inv_b
            ss = jnp.sum(v * v, axis=0, keepdims=True) * inv_b
            var = ss - s * s
            return ((v - s) * jax.lax.rsqrt(var + _EPS)
                    * p_ref[grow:grow + 1, 0:fcp] + p_ref[grow + 1:grow + 2, 0:fcp])

        # trunk: fc1 -> bn1 -> relu -> fc2 -> bn2 -> relu (fc1/fc2 biases cancel in BN).
        # Activations are lane-padded to fcp=128; padded columns stay exactly zero.
        t = jnp.dot(tz, w_ref[R_FC1:R_FC1 + k1, 0:fcp], preferred_element_type=f32)
        t = jnp.maximum(bn_batch(t, 0), 0.0)                     # (B, fcp)
        t = jnp.dot(t, w_ref[R_FC2:R_FC2 + fcp, 0:fcp], preferred_element_type=f32)
        feat = jnp.maximum(bn_batch(t, 2), 0.0)                  # (B, fcp)

        # Fused heads: one (fcp -> hp) matmul + bias + ReLU, then one block-diagonal
        # (hp -> out_pad) matmul. Single lane-dense (B, out_pad) store.
        a = (jnp.dot(feat, w_ref[R_H1:R_H1 + fcp, :], preferred_element_type=f32)
             + w_ref[R_BIAS:R_BIAS + 1, :])
        a = jnp.maximum(a, 0.0)                                  # (B, hp)
        out = jnp.dot(a, w_ref[R_H2:R_H2 + hp, 0:out_pad], preferred_element_type=f32)
        out_ref[...] = out.astype(out_ref.dtype)

    return kernel


def init_params(key, input_channels, latent_dim=3, num_bins=2, x_scale=0.5, fc_scale=0.25):
    """Kaiming-normal weights (init_weights), zero biases, BN gamma=1 / beta=0 —
    matches a freshly initialized torch module (torch-style weight = (out, in)).
    The fc_*2 head layers have no bias (bias=False in the torch module)."""
    c1 = int(8 * x_scale)        # 4
    c2 = int(16 * x_scale)       # 8
    fc = int(256 * fc_scale)     # 64

    def kaiming(k, shape):
        fan_in = shape[-1]
        return jax.random.normal(k, shape, jnp.float32) * jnp.sqrt(2.0 / fan_in)

    ks = iter(jax.random.split(key, 12))
    p = {}
    # SimPointNetfeat
    p['wc1'] = kaiming(next(ks), (c1, input_channels)); p['bc1'] = jnp.zeros((1, c1), jnp.float32)
    p['gc1'] = jnp.ones((1, c1), jnp.float32);          p['bec1'] = jnp.zeros((1, c1), jnp.float32)
    p['wc2'] = kaiming(next(ks), (c2, c1));             p['bc2'] = jnp.zeros((1, c2), jnp.float32)
    p['gc2'] = jnp.ones((1, c2), jnp.float32);          p['bec2'] = jnp.zeros((1, c2), jnp.float32)
    # trunk
    p['wfc1'] = kaiming(next(ks), (fc, c2 + latent_dim)); p['bfc1'] = jnp.zeros((1, fc), jnp.float32)
    p['g1'] = jnp.ones((1, fc), jnp.float32);             p['be1'] = jnp.zeros((1, fc), jnp.float32)
    p['wfc2'] = kaiming(next(ks), (fc, fc));              p['bfc2'] = jnp.zeros((1, fc), jnp.float32)
    p['g2'] = jnp.ones((1, fc), jnp.float32);             p['be2'] = jnp.zeros((1, fc), jnp.float32)
    # heads
    p['wce1'] = kaiming(next(ks), (fc, fc)); p['bce1'] = jnp.zeros((1, fc), jnp.float32)
    p['wce2'] = kaiming(next(ks), (3, fc))
    p['ws1'] = kaiming(next(ks), (fc, fc));  p['bs1'] = jnp.zeros((1, fc), jnp.float32)
    p['ws2'] = kaiming(next(ks), (3, fc))
    p['whr1'] = kaiming(next(ks), (fc, fc)); p['bhr1'] = jnp.zeros((1, fc), jnp.float32)
    p['whr2'] = kaiming(next(ks), (1, fc))
    p['wdir1'] = kaiming(next(ks), (fc, fc)); p['bdir1'] = jnp.zeros((1, fc), jnp.float32)
    p['wdir2'] = kaiming(next(ks), (num_bins, fc))
    return p


def object_feat_encoder(x_ncw, z, params):
    """x_ncw: (B, C_in, N) torch-style channel-first; z: (B, latent_dim).
    Returns (B, 3+3+1+num_bins)."""
    f32 = jnp.float32
    x = x_ncw.astype(f32)                 # stays channel-first — no host transpose
    z = z.astype(f32)
    B, Cin, N = x.shape
    latent = z.shape[1]
    c1 = params['wc1'].shape[0]
    c2 = params['wc2'].shape[0]
    fc = params['wfc1'].shape[0]
    num_bins = params['wdir2'].shape[0]
    out_dim = 3 + 3 + 1 + num_bins

    # padded / aligned geometry
    k1 = _round_up(c2 + latent, 8)            # fc1 contraction dim (11 -> 16)
    fcp = _round_up(fc, 128)                  # trunk activation width (64 -> 128)
    hp = _round_up(4 * fc, 128)               # fused head width (256)
    out_pad = 128                             # lane-dense output slab, sliced outside
    gcol = _round_up(max(Cin, c1), 8)         # gamma column inside conv rows
    PW = max(128, fcp, gcol + 2)

    r_c1 = 8
    r_c2 = r_c1 + _round_up(c1, 8)
    p_rows = r_c2 + _round_up(c2, 8)

    # --- pslab: bn1/bn2 gamma+beta rows + conv rows [weights | gamma | beta]  (one DMA) ---
    pslab = jnp.zeros((p_rows, PW), f32)
    pslab = pslab.at[0, 0:fc].set(params['g1'].reshape(-1))
    pslab = pslab.at[1, 0:fc].set(params['be1'].reshape(-1))
    pslab = pslab.at[2, 0:fc].set(params['g2'].reshape(-1))
    pslab = pslab.at[3, 0:fc].set(params['be2'].reshape(-1))
    pslab = pslab.at[r_c1:r_c1 + c1, 0:Cin].set(params['wc1'])
    pslab = pslab.at[r_c1:r_c1 + c1, gcol].set(params['gc1'].reshape(-1))
    pslab = pslab.at[r_c1:r_c1 + c1, gcol + 1].set(params['bec1'].reshape(-1))
    pslab = pslab.at[r_c2:r_c2 + c2, 0:c1].set(params['wc2'])
    pslab = pslab.at[r_c2:r_c2 + c2, gcol].set(params['gc2'].reshape(-1))
    pslab = pslab.at[r_c2:r_c2 + c2, gcol + 1].set(params['bec2'].reshape(-1))

    # --- wslab: all matmul weights + head L1 bias, 8-row / 128-lane aligned blocks (one DMA) ---
    R_BIAS = 0
    R_FC1 = 8
    R_FC2 = R_FC1 + k1
    R_H1 = R_FC2 + fcp
    R_H2 = R_H1 + fcp
    w_rows = R_H2 + hp

    wslab = jnp.zeros((w_rows, hp), f32)
    head_b = jnp.concatenate([params['bce1'].reshape(-1), params['bs1'].reshape(-1),
                              params['bhr1'].reshape(-1), params['bdir1'].reshape(-1)])
    wslab = wslab.at[R_BIAS, 0:4 * fc].set(head_b)
    wslab = wslab.at[R_FC1:R_FC1 + c2 + latent, 0:fc].set(params['wfc1'].T)
    wslab = wslab.at[R_FC2:R_FC2 + fc, 0:fc].set(params['wfc2'].T)
    h1w = jnp.concatenate([params['wce1'], params['ws1'],
                           params['whr1'], params['wdir1']], axis=0).T       # (fc, 4*fc)
    wslab = wslab.at[R_H1:R_H1 + fc, 0:4 * fc].set(h1w)
    wslab = wslab.at[R_H2 + 0 * fc:R_H2 + 1 * fc, 0:3].set(params['wce2'].T)
    wslab = wslab.at[R_H2 + 1 * fc:R_H2 + 2 * fc, 3:6].set(params['ws2'].T)
    wslab = wslab.at[R_H2 + 2 * fc:R_H2 + 3 * fc, 6:7].set(params['whr2'].T)
    wslab = wslab.at[R_H2 + 3 * fc:R_H2 + 4 * fc, 7:7 + num_bins].set(params['wdir2'].T)
    # NOTE: bc1/bc2/bfc1/bfc2 feed train-mode BatchNorm and cancel exactly — not shipped.

    dims = (B, N, Cin, latent, c1, c2, fc, fcp, hp, k1, out_pad,
            gcol, r_c1, r_c2, R_BIAS, R_FC1, R_FC2, R_H1, R_H2)
    kernel = _make_kernel(dims)

    # advisory cost estimate + VMEM limit clamped to device capacity (v7x: 64 MiB per core)
    flops = int(2 * B * N * (Cin * c1 + c1 * c2)
                + 2 * B * (k1 * fcp + fcp * fcp + fcp * hp + hp * out_pad))
    param_bytes = 4 * (pslab.size + wslab.size)
    io_bytes = 4 * (x.size + z.size + B * out_pad)
    act_bytes = 4 * B * N * (Cin + c1 + c2)
    need = int(2 * (io_bytes + param_bytes) + 2 * act_bytes + (4 << 20))
    try:
        cap = int(getattr(pltpu.get_tpu_info(), "vmem_capacity_bytes", 0)) or (64 << 20)
    except Exception:
        cap = 64 << 20
    vmem_limit = int(min(int(0.75 * cap), max(16 << 20, need)))

    vmem = pl.BlockSpec(memory_space=pltpu.MemorySpace.VMEM)
    # TODO(synk): add a B-tiled grid (dimension_semantics=("parallel",)) once BN batch-stats
    #             are restructured as a two-pass / accumulated scheme (v7x second core, and
    #             BlockSpec pipelining of x for very large B).
    out_padded = pl.pallas_call(
        kernel,
        out_shape=jax.ShapeDtypeStruct((B, out_pad), f32),
        in_specs=[vmem] * 4,          # x, z, pslab, wslab — everything tiny, single program
        out_specs=vmem,
        compiler_params=pltpu.CompilerParams(vmem_limit_bytes=vmem_limit),
        cost_estimate=pl.CostEstimate(flops=flops, transcendentals=int(c1 + c2 + 2 * fcp),
                                      bytes_accessed=int(io_bytes + param_bytes)),
    )(x, z, pslab, wslab)
    return out_padded[:, :out_dim]


def _reference(x, z, p):
    """Pure-JAX reference matching the torch forward (train-mode BN)."""
    def bn(h, g, b, axes):
        m = jnp.mean(h, axis=axes, keepdims=True)
        v = jnp.mean(jnp.square(h - m), axis=axes, keepdims=True)
        return (h - m) * jax.lax.rsqrt(v + _EPS) * g + b
    c1 = p['wc1'].shape[0]; c2 = p['wc2'].shape[0]
    h = jnp.einsum('dc,bcn->bdn', p['wc1'], x) + p['bc1'].reshape(1, c1, 1)
    h = jax.nn.relu(bn(h, p['gc1'].reshape(1, c1, 1), p['bec1'].reshape(1, c1, 1), (0, 2)))
    h = jnp.einsum('dc,bcn->bdn', p['wc2'], h) + p['bc2'].reshape(1, c2, 1)
    h = jax.nn.relu(bn(h, p['gc2'].reshape(1, c2, 1), p['bec2'].reshape(1, c2, 1), (0, 2)))
    feat_pn = jnp.max(h, axis=2)
    t = jnp.concatenate([feat_pn, z], axis=1)
    t = jax.nn.relu(bn(t @ p['wfc1'].T + p['bfc1'], p['g1'], p['be1'], (0,)))
    feat = jax.nn.relu(bn(t @ p['wfc2'].T + p['bfc2'], p['g2'], p['be2'], (0,)))
    def head(w1, b1, w2):
        return jax.nn.relu(feat @ w1.T + b1) @ w2.T
    return jnp.concatenate([head(p['wce1'], p['bce1'], p['wce2']),
                            head(p['ws1'], p['bs1'], p['ws2']),
                            head(p['whr1'], p['bhr1'], p['whr2']),
                            head(p['wdir1'], p['bdir1'], p['wdir2'])], axis=1)


if __name__ == "__main__":
    B, C_IN, N_PTS, LATENT, NUM_BINS = 2, 4, 16, 3, 2

    key = jax.random.PRNGKey(0)
    kx, kz, kp = jax.random.split(key, 3)
    x = jax.random.normal(kx, (B, C_IN, N_PTS), jnp.float32)   # torch NCW point features
    z = jax.random.normal(kz, (B, LATENT), jnp.float32)        # latent code

    params = init_params(kp, input_channels=C_IN, latent_dim=LATENT, num_bins=NUM_BINS)

    out = object_feat_encoder(x, z, params)
    out = jax.block_until_ready(out)
    assert out.shape == (B, 3 + 3 + 1 + NUM_BINS), out.shape
    assert bool(jnp.all(jnp.isfinite(out)))

    ref = jax.block_until_ready(_reference(x, z, params))
    assert bool(jnp.allclose(out, ref, atol=2e-3, rtol=2e-3)), (out, ref)
    print("KERNEL_OK")
</pallas_src>

<mosaic_0001>
module attributes {stable_mosaic.version = 11 : i64} {
  func.func @kernel(%arg0: memref<2x4x16xf32, #tpu.memory_space<vmem>>, %arg1: memref<2x3xf32, #tpu.memory_space<vmem>>, %arg2: memref<24x128xf32, #tpu.memory_space<vmem>>, %arg3: memref<536x256xf32, #tpu.memory_space<vmem>>, %arg4: memref<2x128xf32, #tpu.memory_space<vmem>>) attributes {dimension_semantics = [], scalar_prefetch = 0 : i64, scratch_operands = 0 : i64, tpu.core_type = #tpu.core_type<tc>} {
    %c0 = arith.constant 0 : index
    %c0_0 = arith.constant 0 : index
    %c0_1 = arith.constant 0 : index
    %0 = vector.load %arg0[%c0, %c0_0, %c0_1] : memref<2x4x16xf32, #tpu.memory_space<vmem>>, vector<2x4x16xf32>
    %c8 = arith.constant 8 : index
    %c0_2 = arith.constant 0 : index
    %1 = vector.load %arg2[%c8, %c0_2] : memref<24x128xf32, #tpu.memory_space<vmem>>, vector<4x128xf32>
    %2 = vector.extract_strided_slice %0 {offsets = [0, 0, 0], sizes = [2, 1, 16], strides = [1, 1, 1]} : vector<2x4x16xf32> to vector<2x1x16xf32>
    %3 = vector.extract_strided_slice %1 {offsets = [0, 0], sizes = [4, 1], strides = [1, 1]} : vector<4x128xf32> to vector<4x1xf32>
    %4 = vector.shape_cast %3 : vector<4x1xf32> to vector<1x4x1xf32>
    %5 = vector.broadcast %2 : vector<2x1x16xf32> to vector<2x4x16xf32>
    %6 = vector.broadcast %4 : vector<1x4x1xf32> to vector<2x4x16xf32>
    %7 = arith.mulf %5, %6 : vector<2x4x16xf32>
    %8 = vector.extract_strided_slice %0 {offsets = [0, 1, 0], sizes = [2, 1, 16], strides = [1, 1, 1]} : vector<2x4x16xf32> to vector<2x1x16xf32>
    %9 = vector.extract_strided_slice %1 {offsets = [0, 1], sizes = [4, 1], strides = [1, 1]} : vector<4x128xf32> to vector<4x1xf32>
    %10 = vector.shape_cast %9 : vector<4x1xf32> to vector<1x4x1xf32>
    %11 = vector.broadcast %8 : vector<2x1x16xf32> to vector<2x4x16xf32>
    %12 = vector.broadcast %10 : vector<1x4x1xf32> to vector<2x4x16xf32>
    %13 = arith.mulf %11, %12 : vector<2x4x16xf32>
    %14 = arith.addf %7, %13 : vector<2x4x16xf32>
    %15 = vector.extract_strided_slice %0 {offsets = [0, 2, 0], sizes = [2, 1, 16], strides = [1, 1, 1]} : vector<2x4x16xf32> to vector<2x1x16xf32>
    %16 = vector.extract_strided_slice %1 {offsets = [0, 2], sizes = [4, 1], strides = [1, 1]} : vector<4x128xf32> to vector<4x1xf32>
    %17 = vector.shape_cast %16 : vector<4x1xf32> to vector<1x4x1xf32>
    %18 = vector.broadcast %15 : vector<2x1x16xf32> to vector<2x4x16xf32>
    %19 = vector.broadcast %17 : vector<1x4x1xf32> to vector<2x4x16xf32>
    %20 = arith.mulf %18, %19 : vector<2x4x16xf32>
    %21 = arith.addf %14, %20 : vector<2x4x16xf32>
    %22 = vector.extract_strided_slice %0 {offsets = [0, 3, 0], sizes = [2, 1, 16], strides = [1, 1, 1]} : vector<2x4x16xf32> to vector<2x1x16xf32>
    %23 = vector.extract_strided_slice %1 {offsets = [0, 3], sizes = [4, 1], strides = [1, 1]} : vector<4x128xf32> to vector<4x1xf32>
    %24 = vector.shape_cast %23 : vector<4x1xf32> to vector<1x4x1xf32>
    %25 = vector.broadcast %22 : vector<2x1x16xf32> to vector<2x4x16xf32>
    %26 = vector.broadcast %24 : vector<1x4x1xf32> to vector<2x4x16xf32>
    %27 = arith.mulf %25, %26 : vector<2x4x16xf32>
    %28 = arith.addf %21, %27 : vector<2x4x16xf32>
    %cst = arith.constant dense<0.000000e+00> : vector<4xf32>
    %29 = vector.multi_reduction <add>, %28, %cst [0, 2] : vector<2x4x16xf32> to vector<4xf32>
    %30 = vector.shape_cast %29 : vector<4xf32> to vector<1x4x1xf32>
    %cst_3 = arith.constant 3.125000e-02 : f32
    %31 = vector.broadcast %cst_3 : f32 to vector<1x4x1xf32>
    %32 = arith.mulf %30, %31 : vector<1x4x1xf32>
    %33 = arith.mulf %28, %28 : vector<2x4x16xf32>
    %cst_4 = arith.constant dense<0.000000e+00> : vector<4xf32>
    %34 = vector.multi_reduction <add>, %33, %cst_4 [0, 2] : vector<2x4x16xf32> to vector<4xf32>
    %35 = vector.shape_cast %34 : vector<4xf32> to vector<1x4x1xf32>
    %cst_5 = arith.constant 3.125000e-02 : f32
    %36 = vector.broadcast %cst_5 : f32 to vector<1x4x1xf32>
    %37 = arith.mulf %35, %36 : vector<1x4x1xf32>
    %38 = arith.mulf %32, %32 : vector<1x4x1xf32>
    %39 = arith.subf %37, %38 : vector<1x4x1xf32>
    %40 = vector.extract_strided_slice %1 {offsets = [0, 8], sizes = [4, 1], strides = [1, 1]} : vector<4x128xf32> to vector<4x1xf32>
    %41 = vector.shape_cast %40 : vector<4x1xf32> to vector<1x4x1xf32>
    %42 = vector.extract_strided_slice %1 {offsets = [0, 9], sizes = [4, 1], strides = [1, 1]} : vector<4x128xf32> to vector<4x1xf32>
    %43 = vector.shape_cast %42 : vector<4x1xf32> to vector<1x4x1xf32>
    %44 = vector.broadcast %32 : vector<1x4x1xf32> to vector<2x4x16xf32>
    %45 = arith.subf %28, %44 : vector<2x4x16xf32>
    %cst_6 = arith.constant 9.99999974E-6 : f32
    %46 = vector.broadcast %cst_6 : f32 to vector<1x4x1xf32>
    %47 = arith.addf %39, %46 : vector<1x4x1xf32>
    %48 = math.rsqrt %47 : vector<1x4x1xf32>
    %49 = vector.broadcast %48 : vector<1x4x1xf32> to vector<2x4x16xf32>
    %50 = arith.mulf %45, %49 : vector<2x4x16xf32>
    %51 = vector.broadcast %41 : vector<1x4x1xf32> to vector<2x4x16xf32>
    %52 = arith.mulf %50, %51 : vector<2x4x16xf32>
    %53 = vector.broadcast %43 : vector<1x4x1xf32> to vector<2x4x16xf32>
    %54 = arith.addf %52, %53 : vector<2x4x16xf32>
    %cst_7 = arith.constant 0.000000e+00 : f32
    %55 = vector.broadcast %cst_7 : f32 to vector<2x4x16xf32>
    %56 = arith.maximumf %54, %55 : vector<2x4x16xf32>
    %c16 = arith.constant 16 : index
    %c0_8 = arith.constant 0 : index
    %57 = vector.load %arg2[%c16, %c0_8] : memref<24x128xf32, #tpu.memory_space<vmem>>, vector<8x128xf32>
    %58 = vector.extract_strided_slice %56 {offsets = [0, 0, 0], sizes = [2, 1, 16], strides = [1, 1, 1]} : vector<2x4x16xf32> to vector<2x1x16xf32>
    %59 = vector.extract_strided_slice %57 {offsets = [0, 0], sizes = [8, 1], strides = [1, 1]} : vector<8x128xf32> to vector<8x1xf32>
    %60 = vector.shape_cast %59 : vector<8x1xf32> to vector<1x8x1xf32>
    %61 = vector.broadcast %58 : vector<2x1x16xf32> to vector<2x8x16xf32>
    %62 = vector.broadcast %60 : vector<1x8x1xf32> to vector<2x8x16xf32>
    %63 = arith.mulf %61, %62 : vector<2x8x16xf32>
    %64 = vector.extract_strided_slice %56 {offsets = [0, 1, 0], sizes = [2, 1, 16], strides = [1, 1, 1]} : vector<2x4x16xf32> to vector<2x1x16xf32>
    %65 = vector.extract_strided_slice %57 {offsets = [0, 1], sizes = [8, 1], strides = [1, 1]} : vector<8x128xf32> to vector<8x1xf32>
    %66 = vector.shape_cast %65 : vector<8x1xf32> to vector<1x8x1xf32>
    %67 = vector.broadcast %64 : vector<2x1x16xf32> to vector<2x8x16xf32>
    %68 = vector.broadcast %66 : vector<1x8x1xf32> to vector<2x8x16xf32>
    %69 = arith.mulf %67, %68 : vector<2x8x16xf32>
    %70 = arith.addf %63, %69 : vector<2x8x16xf32>
    %71 = vector.extract_strided_slice %56 {offsets = [0, 2, 0], sizes = [2, 1, 16], strides = [1, 1, 1]} : vector<2x4x16xf32> to vector<2x1x16xf32>
    %72 = vector.extract_strided_slice %57 {offsets = [0, 2], sizes = [8, 1], strides = [1, 1]} : vector<8x128xf32> to vector<8x1xf32>
    %73 = vector.shape_cast %72 : vector<8x1xf32> to vector<1x8x1xf32>
    %74 = vector.broadcast %71 : vector<2x1x16xf32> to vector<2x8x16xf32>
    %75 = vector.broadcast %73 : vector<1x8x1xf32> to vector<2x8x16xf32>
    %76 = arith.mulf %74, %75 : vector<2x8x16xf32>
    %77 = arith.addf %70, %76 : vector<2x8x16xf32>
    %78 = vector.extract_strided_slice %56 {offsets = [0, 3, 0], sizes = [2, 1, 16], strides = [1, 1, 1]} : vector<2x4x16xf32> to vector<2x1x16xf32>
    %79 = vector.extract_strided_slice %57 {offsets = [0, 3], sizes = [8, 1], strides = [1, 1]} : vector<8x128xf32> to vector<8x1xf32>
    %80 = vector.shape_cast %79 : vector<8x1xf32> to vector<1x8x1xf32>
    %81 = vector.broadcast %78 : vector<2x1x16xf32> to vector<2x8x16xf32>
    %82 = vector.broadcast %80 : vector<1x8x1xf32> to vector<2x8x16xf32>
    %83 = arith.mulf %81, %82 : vector<2x8x16xf32>
    %84 = arith.addf %77, %83 : vector<2x8x16xf32>
    %cst_9 = arith.constant dense<0.000000e+00> : vector<8xf32>
    %85 = vector.multi_reduction <add>, %84, %cst_9 [0, 2] : vector<2x8x16xf32> to vector<8xf32>
    %86 = vector.shape_cast %85 : vector<8xf32> to vector<1x8x1xf32>
    %cst_10 = arith.constant 3.125000e-02 : f32
    %87 = vector.broadcast %cst_10 : f32 to vector<1x8x1xf32>
    %88 = arith.mulf %86, %87 : vector<1x8x1xf32>
    %89 = arith.mulf %84, %84 : vector<2x8x16xf32>
    %cst_11 = arith.constant dense<0.000000e+00> : vector<8xf32>
    %90 = vector.multi_reduction <add>, %89, %cst_11 [0, 2] : vector<2x8x16xf32> to vector<8xf32>
    %91 = vector.shape_cast %90 : vector<8xf32> to vector<1x8x1xf32>
    %cst_12 = arith.constant 3.125000e-02 : f32
    %92 = vector.broadcast %cst_12 : f32 to vector<1x8x1xf32>
    %93 = arith.mulf %91, %92 : vector<1x8x1xf32>
    %94 = arith.mulf %88, %88 : vector<1x8x1xf32>
    %95 = arith.subf %93, %94 : vector<1x8x1xf32>
    %96 = vector.extract_strided_slice %57 {offsets = [0, 8], sizes = [8, 1], strides = [1, 1]} : vector<8x128xf32> to vector<8x1xf32>
    %97 = vector.shape_cast %96 : vector<8x1xf32> to vector<1x8x1xf32>
    %98 = vector.extract_strided_slice %57 {offsets = [0, 9], sizes = [8, 1], strides = [1, 1]} : vector<8x128xf32> to vector<8x1xf32>
    %99 = vector.shape_cast %98 : vector<8x1xf32> to vector<1x8x1xf32>
    %100 = vector.broadcast %88 : vector<1x8x1xf32> to vector<2x8x16xf32>
    %101 = arith.subf %84, %100 : vector<2x8x16xf32>
    %cst_13 = arith.constant 9.99999974E-6 : f32
    %102 = vector.broadcast %cst_13 : f32 to vector<1x8x1xf32>
    %103 = arith.addf %95, %102 : vector<1x8x1xf32>
    %104 = math.rsqrt %103 : vector<1x8x1xf32>
    %105 = vector.broadcast %104 : vector<1x8x1xf32> to vector<2x8x16xf32>
    %106 = arith.mulf %101, %105 : vector<2x8x16xf32>
    %107 = vector.broadcast %97 : vector<1x8x1xf32> to vector<2x8x16xf32>
    %108 = arith.mulf %106, %107 : vector<2x8x16xf32>
    %109 = vector.broadcast %99 : vector<1x8x1xf32> to vector<2x8x16xf32>
    %110 = arith.addf %108, %109 : vector<2x8x16xf32>
    %cst_14 = arith.constant 0.000000e+00 : f32
    %111 = vector.broadcast %cst_14 : f32 to vector<2x8x16xf32>
    %112 = arith.maximumf %110, %111 : vector<2x8x16xf32>
    %cst_15 = arith.constant dense<0xFF800000> : vector<2x8xf32>
    %113 = vector.multi_reduction <maximumf>, %112, %cst_15 [2] : vector<2x8x16xf32> to vector<2x8xf32>
    %c0_16 = arith.constant 0 : index
    %c0_17 = arith.constant 0 : index
    %114 = vector.load %arg1[%c0_16, %c0_17] : memref<2x3xf32, #tpu.memory_space<vmem>>, vector<2x3xf32>
    %cst_18 = arith.constant 0.000000e+00 : f32
    %115 = vector.broadcast %cst_18 : f32 to vector<2x5xf32>
    %116 = tpu.concatenate %113, %114, %115 in 1 : vector<2x8xf32>, vector<2x3xf32>, vector<2x5xf32> -> vector<2x16xf32>
    %c8_19 = arith.constant 8 : index
    %c0_20 = arith.constant 0 : index
    %117 = vector.load %arg3[%c8_19, %c0_20] : memref<536x256xf32, #tpu.memory_space<vmem>>, vector<16x128xf32>
    %cst_21 = arith.constant dense<0.000000e+00> : vector<2x128xf32>
    %118 = tpu.matmul %116, %117, %cst_21 {dimension_numbers = #tpu.dot_dimension_numbers<[1], [0], [0], [1], [0, 0, 1, 1], [], []>} : vector<2x16xf32>, vector<16x128xf32>, vector<2x128xf32> -> vector<2x128xf32>
    %cst_22 = arith.constant dense<0.000000e+00> : vector<128xf32>
    %119 = vector.multi_reduction <add>, %118, %cst_22 [0] : vector<2x128xf32> to vector<128xf32>
    %120 = vector.shape_cast %119 : vector<128xf32> to vector<1x128xf32>
    %cst_23 = arith.constant 5.000000e-01 : f32
    %121 = vector.broadcast %cst_23 : f32 to vector<1x128xf32>
    %122 = arith.mulf %120, %121 : vector<1x128xf32>
    %123 = arith.mulf %118, %118 : vector<2x128xf32>
    %cst_24 = arith.constant dense<0.000000e+00> : vector<128xf32>
    %124 = vector.multi_reduction <add>, %123, %cst_24 [0] : vector<2x128xf32> to vector<128xf32>
    %125 = vector.shape_cast %124 : vector<128xf32> to vector<1x128xf32>
    %cst_25 = arith.constant 5.000000e-01 : f32
    %126 = vector.broadcast %cst_25 : f32 to vector<1x128xf32>
    %127 = arith.mulf %125, %126 : vector<1x128xf32>
    %128 = arith.mulf %122, %122 : vector<1x128xf32>
    %129 = arith.subf %127, %128 : vector<1x128xf32>
    %130 = vector.broadcast %122 : vector<1x128xf32> to vector<2x128xf32>
    %131 = arith.subf %118, %130 : vector<2x128xf32>
    %cst_26 = arith.constant 9.99999974E-6 : f32
    %132 = vector.broadcast %cst_26 : f32 to vector<1x128xf32>
    %133 = arith.addf %129, %132 : vector<1x128xf32>
    %134 = math.rsqrt %133 : vector<1x128xf32>
    %135 = vector.broadcast %134 : vector<1x128xf32> to vector<2x128xf32>
    %136 = arith.mulf %131, %135 : vector<2x128xf32>
    %c0_27 = arith.constant 0 : index
    %c0_28 = arith.constant 0 : index
    %137 = vector.load %arg2[%c0_27, %c0_28] : memref<24x128xf32, #tpu.memory_space<vmem>>, vector<1x128xf32>
    %138 = vector.broadcast %137 : vector<1x128xf32> to vector<2x128xf32>
    %139 = arith.mulf %136, %138 : vector<2x128xf32>
    %c1 = arith.constant 1 : index
    %c0_29 = arith.constant 0 : index
    %140 = vector.load %arg2[%c1, %c0_29] : memref<24x128xf32, #tpu.memory_space<vmem>>, vector<1x128xf32>
    %141 = vector.broadcast %140 : vector<1x128xf32> to vector<2x128xf32>
    %142 = arith.addf %139, %141 : vector<2x128xf32>
    %cst_30 = arith.constant 0.000000e+00 : f32
    %143 = vector.broadcast %cst_30 : f32 to vector<2x128xf32>
    %144 = arith.maximumf %142, %143 : vector<2x128xf32>
    %c24 = arith.constant 24 : index
    %c0_31 = arith.constant 0 : index
    %145 = vector.load %arg3[%c24, %c0_31] : memref<536x256xf32, #tpu.memory_space<vmem>>, vector<128x128xf32>
    %cst_32 = arith.constant dense<0.000000e+00> : vector<2x128xf32>
    %146 = tpu.matmul %144, %145, %cst_32 {dimension_numbers = #tpu.dot_dimension_numbers<[1], [0], [0], [1], [0, 0, 1, 1], [], []>} : vector<2x128xf32>, vector<128x128xf32>, vector<2x128xf32> -> vector<2x128xf32>
    %cst_33 = arith.constant dense<0.000000e+00> : vector<128xf32>
    %147 = vector.multi_reduction <add>, %146, %cst_33 [0] : vector<2x128xf32> to vector<128xf32>
    %148 = vector.shape_cast %147 : vector<128xf32> to vector<1x128xf32>
    %cst_34 = arith.constant 5.000000e-01 : f32
    %149 = vector.broadcast %cst_34 : f32 to vector<1x128xf32>
    %150 = arith.mulf %148, %149 : vector<1x128xf32>
    %151 = arith.mulf %146, %146 : vector<2x128xf32>
    %cst_35 = arith.constant dense<0.000000e+00> : vector<128xf32>
    %152 = vector.multi_reduction <add>, %151, %cst_35 [0] : vector<2x128xf32> to vector<128xf32>
    %153 = vector.shape_cast %152 : vector<128xf32> to vector<1x128xf32>
    %cst_36 = arith.constant 5.000000e-01 : f32
    %154 = vector.broadcast %cst_36 : f32 to vector<1x128xf32>
    %155 = arith.mulf %153, %154 : vector<1x128xf32>
    %156 = arith.mulf %150, %150 : vector<1x128xf32>
    %157 = arith.subf %155, %156 : vector<1x128xf32>
    %158 = vector.broadcast %150 : vector<1x128xf32> to vector<2x128xf32>
    %159 = arith.subf %146, %158 : vector<2x128xf32>
    %cst_37 = arith.constant 9.99999974E-6 : f32
    %160 = vector.broadcast %cst_37 : f32 to vector<1x128xf32>
    %161 = arith.addf %157, %160 : vector<1x128xf32>
    %162 = math.rsqrt %161 : vector<1x128xf32>
    %163 = vector.broadcast %162 : vector<1x128xf32> to vector<2x128xf32>
    %164 = arith.mulf %159, %163 : vector<2x128xf32>
    %c2 = arith.constant 2 : index
    %c0_38 = arith.constant 0 : index
    %165 = vector.load %arg2[%c2, %c0_38] : memref<24x128xf32, #tpu.memory_space<vmem>>, vector<1x128xf32>
    %166 = vector.broadcast %165 : vector<1x128xf32> to vector<2x128xf32>
    %167 = arith.mulf %164, %166 : vector<2x128xf32>
    %c3 = arith.constant 3 : index
    %c0_39 = arith.constant 0 : index
    %168 = vector.load %arg2[%c3, %c0_39] : memref<24x128xf32, #tpu.memory_space<vmem>>, vector<1x128xf32>
    %169 = vector.broadcast %168 : vector<1x128xf32> to vector<2x128xf32>
    %170 = arith.addf %167, %169 : vector<2x128xf32>
    %cst_40 = arith.constant 0.000000e+00 : f32
    %171 = vector.broadcast %cst_40 : f32 to vector<2x128xf32>
    %172 = arith.maximumf %170, %171 : vector<2x128xf32>
    %c152 = arith.constant 152 : index
    %c0_41 = arith.constant 0 : index
    %173 = vector.load %arg3[%c152, %c0_41] : memref<536x256xf32, #tpu.memory_space<vmem>>, vector<128x256xf32>
    %cst_42 = arith.constant dense<0.000000e+00> : vector<2x256xf32>
    %174 = tpu.matmul %172, %173, %cst_42 {dimension_numbers = #tpu.dot_dimension_numbers<[1], [0], [0], [1], [0, 0, 1, 1], [], []>} : vector<2x128xf32>, vector<128x256xf32>, vector<2x256xf32> -> vector<2x256xf32>
    %c0_43 = arith.constant 0 : index
    %c0_44 = arith.constant 0 : index
    %175 = vector.load %arg3[%c0_43, %c0_44] : memref<536x256xf32, #tpu.memory_space<vmem>>, vector<1x256xf32>
    %176 = vector.broadcast %175 : vector<1x256xf32> to vector<2x256xf32>
    %177 = arith.addf %174, %176 : vector<2x256xf32>
    %cst_45 = arith.constant 0.000000e+00 : f32
    %178 = vector.broadcast %cst_45 : f32 to vector<2x256xf32>
    %179 = arith.maximumf %177, %178 : vector<2x256xf32>
    %c280 = arith.constant 280 : index
    %c0_46 = arith.constant 0 : index
    %180 = vector.load %arg3[%c280, %c0_46] : memref<536x256xf32, #tpu.memory_space<vmem>>, vector<256x128xf32>
    %cst_47 = arith.constant dense<0.000000e+00> : vector<2x128xf32>
    %181 = tpu.matmul %179, %180, %cst_47 {dimension_numbers = #tpu.dot_dimension_numbers<[1], [0], [0], [1], [0, 0, 1, 1], [], []>} : vector<2x256xf32>, vector<256x128xf32>, vector<2x128xf32> -> vector<2x128xf32>
    %c0_48 = arith.constant 0 : index
    %c0_49 = arith.constant 0 : index
    %182 = vector.load %arg4[%c0_48, %c0_49] : memref<2x128xf32, #tpu.memory_space<vmem>>, vector<2x128xf32>
    tpu.vector_store %arg4[%c0_48, %c0_49], %181 {strides = array<i32>} : memref<2x128xf32, #tpu.memory_space<vmem>>, vector<2x128xf32>,
    return
  }
}

</mosaic_0001>

<bundles_post_ra>
// kernel: tpu_custom_call.1
= control target key start
LH: loop header
LB: loop body
LE: loop exit
PB: predicated region body
PF: predicated region fallthrough
CT: control target
= control target key end

     0   :  { %9 = vsyncpa [#allocation3], 0  ;;  %s1165_s0 = inlined_call_operand.hbm [shape: f32[2,4,16], index: 0, kind: input, shape index: {}]   ;;  %s1166_s1 = inlined_call_operand.hbm [shape: f32[2,3], index: 1, kind: input, shape index: {}]   ;;  %s1167_s2 = inlined_call_operand.hbm [shape: f32[24,128], index: 2, kind: input, shape index: {}]   ;;  %s1168_s3 = inlined_call_operand.hbm [shape: f32[536,256], index: 3, kind: input, shape index: {}]   ;;  %s1169_s4 = inlined_call_operand.hbm [shape: f32[2,128], index: 4, kind: output, shape index: {}]  }
   0x1   :  { %10 = vsyncpa [#allocation6], 0 }
   0x2   :  { %11 = vsyncpa [#allocation9], 0 }
   0x3   :  { %12 = vsyncpa [#allocation4], 0  ;;  %s1025_s15 = smov [#allocation5]   ;;  %s1026_s17 = smov [#allocation2]  }
   0x4   :  { %s31_s16 = sshll.u32 %s1025_s15, 4  ;;  %s18_s18 = sshll.u32 %s1026_s17, 4  ;;  %s32_s16 = int_to_ptr.vmem [resolvable:$true] %s31_s16  ;;  %s19_s18 = int_to_ptr.vmem [resolvable:$true] %s18_s18 }
   0x5   :  { %s925_s19 = scalar_lea.vmem %s32_s16, 32  ;;  %p930_p1 = scmp.lt.s32.totalorder %s32_s16, %s32_s16 }
   0x6   :  { %p926_p0 = scmp.ne.s32.totalorder %s32_s16, %s925_s19  ;;  %p931_p2 = scmp.lt.s32.totalorder %s925_s19, %s925_s19 }
   0x8   :  { %p932_p3 = por %p931_p2, %p930_p1 }
   0xa   :  { %p933_p4 = pnand %p932_p3, %p926_p0 }
   0xc   :  { %936 = shalt.err (!%p933_p4)
}
   0xd   :  { %34 = dma.hbm_to_vmem [thread:$0]  %s1166_s1, 32, %s32_s16, [#allocation6]  }
   0xe   :  { %s945_s22 = scalar_lea.vmem %s19_s18, 128  ;;  %p950_p6 = scmp.lt.s32.totalorder %s19_s18, %s19_s18 }
   0xf   :  { %p946_p5 = scmp.ne.s32.totalorder %s19_s18, %s945_s22  ;;  %p951_p7 = scmp.lt.s32.totalorder %s945_s22, %s945_s22 }
  0x11   :  { %p952_p8 = por %p951_p7, %p950_p6 }
  0x13   :  { %p953_p9 = pnand %p952_p8, %p946_p5 }
  0x15   :  { %956 = shalt.err (!%p953_p9)
}
  0x16   :  { %s1027_s23 = smov 64   ;;  %s1028_s24 = smov 4  }
  0x17   :  { %24 = dma.hbm_to_vmem [thread:$0]  %s1165_s0, 128, %s19_s18, [#allocation3], %s1027_s23, %s1027_s23, %s1028_s24  }
  0x18   :  { %s1029_s27 = smov [#allocation7]  }
  0x19   :  { %s40_s28 = sshll.u32 %s1029_s27, 4  ;;  %s41_s28 = int_to_ptr.vmem [resolvable:$true] %s40_s28 }
  0x1a   :  { %s965_s29 = scalar_lea.vmem %s41_s28, 384  ;;  %p970_p11 = scmp.lt.s32.totalorder %s41_s28, %s41_s28 }
  0x1b   :  { %p966_p10 = scmp.ne.s32.totalorder %s41_s28, %s965_s29  ;;  %p971_p12 = scmp.lt.s32.totalorder %s965_s29, %s965_s29 }
  0x1d   :  { %p972_p13 = por %p971_p12, %p970_p11 }
  0x1f   :  { %p973_p0 = pnand %p972_p13, %p966_p10 }
  0x21   :  { %976 = shalt.err (!%p973_p0)
}
  0x22   :  { %s1030_s1 = smov 128   ;;  %s1031_s30 = smov 8  }
  0x23   :  { %46 = dma.hbm_to_vmem [thread:$0]  %s1167_s2, 384, %s41_s28, [#allocation6], %s1030_s1, %s1030_s1, %s1031_s30  }
  0x24   :  { %s1032_s7 = smov [#allocation8]  }
  0x25   :  { %s52_s8 = sshll.u32 %s1032_s7, 4  ;;  %s53_s8 = int_to_ptr.vmem [resolvable:$true] %s52_s8 }
  0x26   :  { %s985_s0 = scalar_lea.vmem %s53_s8, 17152  ;;  %p990_p2 = scmp.lt.s32.totalorder %s53_s8, %s53_s8 }
  0x27   :  { %p986_p1 = scmp.ne.s32.totalorder %s53_s8, %s985_s0  ;;  %p991_p3 = scmp.lt.s32.totalorder %s985_s0, %s985_s0 }
  0x29   :  { %p992_p4 = por %p991_p3, %p990_p2 }
  0x2b   :  { %p993_p5 = pnand %p992_p4, %p986_p1 }
  0x2d   :  { %996 = shalt.err (!%p993_p5)
}
  0x2e   :  { %s1033_s9 = smov 256   ;;  %s1034_s10 = smov 16  }
  0x2f   :  { %58 = dma.hbm_to_vmem [thread:$0]  %s1168_s3, 17152, %s53_s8, [#allocation9], %s1033_s9, %s1033_s9, %s1034_s10  }
  0x30   :  { %1017 = dma.done.wait [#allocation3], 128  }
  0x31   :  { %1018 = vsyncadd [#allocation3], 4294967168 }
  0x32   :  { %1019 = dma.done.wait [#allocation6], 416  }
  0x33   :  { %1020 = vsyncadd [#allocation6], 4294966880 }
  0x34   :  { %1021 = dma.done.wait [#allocation9], 17152  }
  0x35   :  { %1022 = vsyncadd [#allocation9], 4294950144  ;;  %v1035_v0 = vmov 0   ;;  %v1036_v1 = vmov 2   ;;  %v73_v2 = vld [vmem:[#allocation7 + $0x8] sm:$0xf]  ;;  %v74_v7 = vlaneseq }
  0x36   :  { %897 = vset.pattern.permute.xlu0 %v1035_v0  ;;  %899 = vset.pattern.permute.xlu1 %v1036_v1  ;;  %v1037_v3 = vmov 1   ;;  %v1038_v4 = vmov 3   ;;  %v1039_v5 = vmov 9   ;;  %v1040_v6 = vmov 8   ;;  %v71_v11 = vld [vmem:[#allocation2] sm:$0xf] }
  0x37   :  { %84 = vperm.xlu0 %897, %v73_v2   ;;  %114 = vperm.xlu1 %899, %v73_v2   ;;  %v1085_v8 = vshrl.u32 %v74_v7, 7  ;;  %v72_v12 = vld [vmem:[#allocation2 + $0x4] sm:$0xf]  ;;  %vm137_vm0 = vcmask 125952   ;;  %v1107_v49 = vld [vmem:[#allocation7 + $0x10] sm:$0xff]  ;;  %vm238_vm1 = vcmask 130048  }
  0x38   :  { %vm1042_vm2 = vmmov 0   ;;  %vm294_vm3 = vcmask 1041409   ;;  %vm301_vm4 = vcmask 64512   ;;  %vm303_vm5 = vcmask 89088   ;;  %s1043_s2 = smov [#allocation10]  }
  0x39   :  { %v1088_v9 = vsub.s32 0, %v1085_v8  ;;  %v1091_v10 = vsub.s32 1, %v1085_v8  ;;  %v1094_v13 = vsub.s32 2, %v1085_v8  ;;  %v1097_v16 = vsub.s32 3, %v1085_v8  ;;  %s765_s3 = sshll.u32 %s1043_s2, 4  ;;  %s766_s3 = int_to_ptr.vmem [resolvable:$true] %s765_s3 }
  0x3a   :  { %vm380_vm6 = vcmask 1041408   ;;  %s997_s13 = scalar_lea.vmem %s766_s3, 32  ;;  %p1002_p7 = scmp.lt.s32.totalorder %s766_s3, %s766_s3 }
  0x3b   :  { %898 = vset.pattern.permute.xlu0 %v1037_v3  ;;  %900 = vset.pattern.permute.xlu1 %v1038_v4  ;;  %v77_v17 = vrot.slane %v71_v11, %v1088_v9  ;;  %v81_v18 = vrot.slane %v72_v12, %v1088_v9  ;;  %v92_v19 = vrot.slane %v71_v11, %v1091_v10  ;;  %p998_p6 = scmp.ne.s32.totalorder %s766_s3, %s997_s13  ;;  %p1003_p8 = scmp.lt.s32.totalorder %s997_s13, %s997_s13 }
  0x3c   :  { %98 = vperm.xlu0 %898, %v73_v2   ;;  %130 = vperm.xlu1 %900, %v73_v2   ;;  %v96_v20 = vrot.slane %v72_v12, %v1091_v10  ;;  %v108_v21 = vrot.slane %v71_v11, %v1094_v13  ;;  %v112_v22 = vrot.slane %v72_v12, %v1094_v13 }
  0x3d   :  { %v124_v23 = vrot.slane %v71_v11, %v1097_v16  ;;  %v128_v24 = vrot.slane %v72_v12, %v1097_v16  ;;  %p1004_p9 = por %p1003_p8, %p1002_p7 }
  0x3f   :  { %p1005_p10 = pnand %p1004_p9, %p998_p6 }
  0x40   :  { %902 = vset.pattern.permute.xlu1 %v1039_v5  ;;  %901 = vset.pattern.permute.xlu0 %v1040_v6 }
  0xb2   :  { %v85_v14 = vpop.permute.xlu0 %84  ;;  %v115_v15 = vpop.permute.xlu1 %114 }
  0xb3   :  { %v87_v27 = vmul.f32 %v85_v14, %v77_v17  ;;  %v88_v28 = vmul.f32 %v85_v14, %v81_v18  ;;  %v117_v31 = vmul.f32 %v115_v15, %v108_v21  ;;  %v118_v32 = vmul.f32 %v115_v15, %v112_v22 }
  0xb7   :  { %v99_v25 = vpop.permute.xlu0 %98  ;;  %v131_v26 = vpop.permute.xlu1 %130 }
  0xb8   :  { %v101_v29 = vmul.f32 %v99_v25, %v92_v19  ;;  %v102_v30 = vmul.f32 %v99_v25, %v96_v20  ;;  %v133_v35 = vmul.f32 %v131_v26, %v124_v23  ;;  %v134_v36 = vmul.f32 %v131_v26, %v128_v24 }
  0xba   :  { %v103_v33 = vadd.f32 %v101_v29, %v87_v27  ;;  %v104_v34 = vadd.f32 %v102_v30, %v88_v28 }
  0xbc   :  { %v119_v37 = vadd.f32 %v117_v31, %v103_v33  ;;  %v120_v38 = vadd.f32 %v118_v32, %v104_v34 }
  0xbe   :  { %v135_v39 = vadd.f32 %v133_v35, %v119_v37  ;;  %v136_v40 = vadd.f32 %v134_v36, %v120_v38 }
  0xc0   :  { %v138_v41 = vsel %vm137_vm0, %v135_v39, 0.0  ;;  %v139_v42 = vsel %vm137_vm0, %v136_v40, 0.0  ;;  %v144_v43 = vmul.f32 %v135_v39, %v135_v39  ;;  %v145_v44 = vmul.f32 %v136_v40, %v136_v40 }
  0xc1   :  { %v140_v45 = vadd.f32 %v139_v42, %v138_v41 }
  0xc2   :  { %v146_v46 = vsel %vm137_vm0, %v144_v43, 0.0  ;;  %v147_v47 = vsel %vm137_vm0, %v145_v44, 0.0 }
  0xc3   :  { %141 = vadd.xlane.f32.xlu1 %v140_v45  ;;  %v148_v48 = vadd.f32 %v147_v47, %v146_v46 }
  0xc5   :  { %149 = vadd.xlane.f32.xlu0 %v148_v48 }
  0xd4   :  { %167 = vperm.xlu1 %902, %v73_v2  }
  0xd8   :  { %903 = vset.pattern.permute.xlu1 %v1035_v0 }
  0xd9   :  { %185 = vperm.xlu1 %903, %v1107_v49  }
  0xdb   :  { %161 = vperm.xlu0 %901, %v73_v2  }
  0xdd   :  { %904 = vset.pattern.permute.xlu1 %v1037_v3 }
  0xde   :  { %199 = vperm.xlu1 %904, %v1107_v49  }
  0xdf   :  { %908 = vset.pattern.permute.xlu0 %v1039_v5 }
  0xe2   :  { %905 = vset.pattern.permute.xlu1 %v1036_v1 }
  0xe3   :  { %215 = vperm.xlu1 %905, %v1107_v49  }
  0xe7   :  { %906 = vset.pattern.permute.xlu1 %v1038_v4 }
  0xe8   :  { %231 = vperm.xlu1 %906, %v1107_v49  }
  0xec   :  { %907 = vset.pattern.permute.xlu1 %v1040_v6 }
 0x14c   :  { %v142_v50 = vpop.xlane.xlu1 %141 }
 0x14d   :  { %v143_v51 = vmul.f32 0.03125, %v142_v50 }
 0x14e   :  { %v150_v52 = vpop.xlane.xlu0 %149 }
 0x14f   :  { %v151_v53 = vmul.f32 0.03125, %v150_v52  ;;  %v152_v54 = vmul.f32 %v143_v51, %v143_v51  ;;  %v154_v59 = vsub.f32 %v135_v39, %v143_v51  ;;  %v155_v60 = vsub.f32 %v136_v40, %v143_v51 }
 0x150   :  { %v168_v57 = vpop.permute.xlu1 %167 }
 0x151   :  { %v153_v55 = vsub.f32 %v151_v53, %v152_v54 }
 0x153   :  { %v156_v56 = vadd.f32 1e-05, %v153_v55 }
 0x154   :  { %v186_v58 = vpop.permute.xlu1 %185 }
 0x155   :  { %909 = vrsqrt.f32 %v156_v56 }
 0x156   :  { %v162_v62 = vpop.permute.xlu0 %161 }
 0x159   :  { %v200_v63 = vpop.permute.xlu1 %199 }
 0x15e   :  { %v216_v6 = vpop.permute.xlu1 %215 }
 0x162   :  { %v910_v61 = vpop.eup %909 }
 0x163   :  { %v158_v0 = vmul.f32 %v910_v61, %v154_v59  ;;  %v159_v1 = vmul.f32 %v910_v61, %v155_v60  ;;  %v232_v27 = vpop.permute.xlu1 %231 }
 0x165   :  { %v164_v2 = vmul.f32 %v162_v62, %v158_v0  ;;  %v165_v3 = vmul.f32 %v162_v62, %v159_v1 }
 0x167   :  { %v170_v4 = vadd.f32 %v168_v57, %v164_v2  ;;  %v171_v5 = vadd.f32 %v168_v57, %v165_v3  ;;  %v306_v2 = vld [vmem:[#allocation8 + $0x20] sm:$0xff]  ;;  %v1041_v3 = vmov 0.0  }
 0x168   :  { %836 = vmatprep.subr.mxu0 %v1041_v3  ;;  %843 = vmatprep.subr.mxu1 %v1041_v3 }
 0x169   :  { %v172_v11 = vmax.f32 %v170_v4, 0.0  ;;  %v173_v12 = vmax.f32 %v171_v5, 0.0  ;;  %837 = vmatpush3.msra.mxu0 %v306_v2  ;;  %v281_v4 = vld [vmem:[#allocation5] sm:$0x3]  ;;  %v305_v5 = vld [vmem:[#allocation8 + $0x10] sm:$0xff]  ;;  %840 = vmatprep.mubr.msk.f32.mxu0 %vm1042_vm2, %v1041_v3  ;;  %v568_v2 = vld [vmem:[#allocation8 + $0x218] sm:$0xff] }
 0x16a   :  { %838 = vmatprep.subr.mxu0 %v1041_v3  ;;  %875 = vmatprep.mubr.msk.f32.mxu1 %vm1042_vm2, %v1041_v3 }
 0x16b   :  { %v178_v14 = vrot.slane %v172_v11, %v1088_v9  ;;  %v182_v15 = vrot.slane %v173_v12, %v1088_v9  ;;  %v193_v17 = vrot.slane %v172_v11, %v1091_v10  ;;  %v197_v18 = vrot.slane %v173_v12, %v1091_v10  ;;  %839 = vmatpush3.msra.mxu0 %v305_v5  ;;  %v565_v5 = vld [vmem:[#allocation8 + $0x200] sm:$0xff] }
 0x16c   :  { %v209_v19 = vrot.slane %v172_v11, %v1094_v13  ;;  %v213_v20 = vrot.slane %v173_v12, %v1094_v13  ;;  %v225_v21 = vrot.slane %v172_v11, %v1097_v16  ;;  %v229_v22 = vrot.slane %v173_v12, %v1097_v16 }
 0x16d   :  { %v188_v23 = vmul.f32 %v186_v58, %v178_v14  ;;  %v189_v24 = vmul.f32 %v186_v58, %v182_v15  ;;  %v202_v25 = vmul.f32 %v200_v63, %v193_v17  ;;  %v203_v26 = vmul.f32 %v200_v63, %v197_v18 }
 0x16e   :  { %v218_v30 = vmul.f32 %v216_v6, %v209_v19  ;;  %v219_v31 = vmul.f32 %v216_v6, %v213_v20  ;;  %v234_v34 = vmul.f32 %v232_v27, %v225_v21  ;;  %v235_v35 = vmul.f32 %v232_v27, %v229_v22  ;;  %v432_v22 = vld [vmem:[#allocation8 + $0x120] sm:$0xff]  ;;  %v425_v27 = vld [vmem:[#allocation8 + $0xb0] sm:$0xff] }
 0x16f   :  { %v204_v28 = vadd.f32 %v202_v25, %v188_v23  ;;  %v205_v29 = vadd.f32 %v203_v26, %v189_v24  ;;  %v285_v6 = vand.u32 127, %v74_v7  ;;  %844 = vmatpush3.msra.mxu1 %v432_v22  ;;  %v431_v7 = vld [vmem:[#allocation8 + $0x110] sm:$0xff]  ;;  %v428_v24 = vld [vmem:[#allocation8 + $0xe0] sm:$0xff]  ;;  %v554_v22 = vld [vmem:[#allocation8 + $0x1a8] sm:$0xff] }
 0x170   :  { %845 = vmatprep.subr.mxu1 %v1041_v3  ;;  %v429_v23 = vld [vmem:[#allocation8 + $0xf0] sm:$0xff]  ;;  %v426_v26 = vld [vmem:[#allocation8 + $0xc0] sm:$0xff] }
 0x171   :  { %v220_v32 = vadd.f32 %v218_v30, %v204_v28  ;;  %v221_v33 = vadd.f32 %v219_v31, %v205_v29  ;;  %v288_v11 = vsub.s32 %v285_v6, %v1085_v8  ;;  %846 = vmatpush3.msra.mxu1 %v431_v7  ;;  %v430_v8 = vld [vmem:[#allocation8 + $0x100] sm:$0xff]  ;;  %v427_v25 = vld [vmem:[#allocation8 + $0xd0] sm:$0xff]  ;;  %v564_v6 = vld [vmem:[#allocation8 + $0x1f8] sm:$0xff] }
 0x172   :  { %847 = vmatprep.subr.mxu1 %v1041_v3  ;;  %v424_v28 = vld [vmem:[#allocation8 + $0xa0] sm:$0xff]  ;;  %v423_v29 = vld [vmem:[#allocation8 + $0x90] sm:$0xff] }
 0x173   :  { %v236_v36 = vadd.f32 %v234_v34, %v220_v32  ;;  %v237_v13 = vadd.f32 %v235_v35, %v221_v33  ;;  %848 = vmatpush3.msra.mxu1 %v430_v8  ;;  %v422_v30 = vld [vmem:[#allocation8 + $0x80] sm:$0xff]  ;;  %v421_v31 = vld [vmem:[#allocation8 + $0x70] sm:$0xff]  ;;  %v552_v8 = vld [vmem:[#allocation8 + $0x198] sm:$0xff] }
 0x174   :  { %849 = vmatprep.subr.mxu1 %v1041_v3  ;;  %v420_v32 = vld [vmem:[#allocation8 + $0x60] sm:$0xff]  ;;  %v419_v33 = vld [vmem:[#allocation8 + $0x50] sm:$0xff] }
 0x175   :  { %v239_v37 = vsel %vm238_vm1, %v236_v36, 0.0  ;;  %v240_v16 = vsel %vm238_vm1, %v237_v13, 0.0  ;;  %v245_v38 = vmul.f32 %v236_v36, %v236_v36  ;;  %v246_v39 = vmul.f32 %v237_v13, %v237_v13  ;;  %850 = vmatpush3.msra.mxu1 %v429_v23  ;;  %v418_v34 = vld [vmem:[#allocation8 + $0x40] sm:$0xff]  ;;  %v417_v35 = vld [vmem:[#allocation8 + $0x30] sm:$0xff] }
 0x176   :  { %v241_v40 = vadd.f32 %v240_v16, %v239_v37  ;;  %851 = vmatprep.subr.mxu1 %v1041_v3  ;;  %v553_v7 = vld [vmem:[#allocation8 + $0x1a0] sm:$0xff]  ;;  %v551_v23 = vld [vmem:[#allocation8 + $0x190] sm:$0xff] }
 0x177   :  { %v247_v41 = vsel %vm238_vm1, %v245_v38, 0.0  ;;  %v248_v42 = vsel %vm238_vm1, %v246_v39, 0.0  ;;  %852 = vmatpush3.msra.mxu1 %v428_v24  ;;  %v550_v24 = vld [vmem:[#allocation8 + $0x188] sm:$0xff] }
 0x178   :  { %242 = vadd.xlane.f32.xlu1 %v241_v40  ;;  %v249_v43 = vadd.f32 %v248_v42, %v247_v41  ;;  %853 = vmatprep.subr.mxu1 %v1041_v3 }
 0x179   :  { %854 = vmatpush3.msra.mxu1 %v427_v25  ;;  %v549_v25 = vld [vmem:[#allocation8 + $0x180] sm:$0xff] }
 0x17a   :  { %250 = vadd.xlane.f32.xlu0 %v249_v43  ;;  %855 = vmatprep.subr.mxu1 %v1041_v3 }
 0x17b   :  { %856 = vmatpush3.msra.mxu1 %v426_v26  ;;  %v548_v26 = vld [vmem:[#allocation8 + $0x178] sm:$0xff] }
 0x17c   :  { %857 = vmatprep.subr.mxu1 %v1041_v3 }
 0x17d   :  { %858 = vmatpush3.msra.mxu1 %v425_v27  ;;  %v547_v27 = vld [vmem:[#allocation8 + $0x170] sm:$0xff] }
 0x17e   :  { %859 = vmatprep.subr.mxu1 %v1041_v3 }
 0x17f   :  { %860 = vmatpush3.msra.mxu1 %v424_v28  ;;  %v546_v28 = vld [vmem:[#allocation8 + $0x168] sm:$0xff] }
 0x180   :  { %861 = vmatprep.subr.mxu1 %v1041_v3 }
 0x181   :  { %862 = vmatpush3.msra.mxu1 %v423_v29  ;;  %v545_v29 = vld [vmem:[#allocation8 + $0x160] sm:$0xff] }
 0x182   :  { %863 = vmatprep.subr.mxu1 %v1041_v3 }
 0x183   :  { %864 = vmatpush3.msra.mxu1 %v422_v30  ;;  %v544_v30 = vld [vmem:[#allocation8 + $0x158] sm:$0xff] }
 0x184   :  { %865 = vmatprep.subr.mxu1 %v1041_v3 }
 0x185   :  { %866 = vmatpush3.msra.mxu1 %v421_v31  ;;  %v543_v31 = vld [vmem:[#allocation8 + $0x150] sm:$0xff] }
 0x186   :  { %867 = vmatprep.subr.mxu1 %v1041_v3 }
 0x187   :  { %868 = vmatpush3.msra.mxu1 %v420_v32  ;;  %v542_v32 = vld [vmem:[#allocation8 + $0x148] sm:$0xff] }
 0x188   :  { %869 = vmatprep.subr.mxu1 %v1041_v3 }
 0x189   :  { %262 = vperm.xlu1 %907, %v1107_v49   ;;  %870 = vmatpush3.msra.mxu1 %v419_v33  ;;  %v541_v33 = vld [vmem:[#allocation8 + $0x140] sm:$0xff] }
 0x18a   :  { %871 = vmatprep.subr.mxu1 %v1041_v3 }
 0x18b   :  { %872 = vmatpush3.msra.mxu1 %v418_v34  ;;  %v540_v34 = vld [vmem:[#allocation8 + $0x138] sm:$0xff] }
 0x18c   :  { %873 = vmatprep.subr.mxu1 %v1041_v3 }
 0x18d   :  { %874 = vmatpush3.msra.mxu1 %v417_v35  ;;  %v539_v35 = vld [vmem:[#allocation8 + $0x130] sm:$0xff] }
 0x190   :  { %268 = vperm.xlu0 %908, %v1107_v49  }
 0x201   :  { %v243_v44 = vpop.xlane.xlu1 %242 }
 0x202   :  { %v244_v45 = vmul.f32 0.03125, %v243_v44 }
 0x203   :  { %v251_v46 = vpop.xlane.xlu0 %250 }
 0x204   :  { %v252_v47 = vmul.f32 0.03125, %v251_v46  ;;  %v253_v48 = vmul.f32 %v244_v45, %v244_v45  ;;  %v255_v52 = vsub.f32 %v236_v36, %v244_v45  ;;  %v256_v53 = vsub.f32 %v237_v13, %v244_v45 }
 0x205   :  { %v263_v55 = vpop.permute.xlu1 %262 }
 0x206   :  { %v254_v50 = vsub.f32 %v252_v47, %v253_v48 }
 0x208   :  { %v257_v51 = vadd.f32 1e-05, %v254_v50 }
 0x20a   :  { %911 = vrsqrt.f32 %v257_v51 }
 0x20b   :  { %v269_v58 = vpop.permute.xlu0 %268 }
 0x217   :  { %v912_v54 = vpop.eup %911 }
 0x218   :  { %v259_v56 = vmul.f32 %v912_v54, %v255_v52  ;;  %v260_v57 = vmul.f32 %v912_v54, %v256_v53 }
 0x21a   :  { %v265_v59 = vmul.f32 %v263_v55, %v259_v56  ;;  %v266_v60 = vmul.f32 %v263_v55, %v260_v57 }
 0x21c   :  { %v271_v61 = vadd.f32 %v269_v58, %v265_v59  ;;  %v272_v62 = vadd.f32 %v269_v58, %v266_v60  ;;  %v777_v59 = vld [vmem:[#allocation7] ss:$0 sm:$0xff] }
 0x21e   :  { %v273_v49 = vmax.f32 %v271_v61, 0.0  ;;  %v274_v63 = vmax.f32 %v272_v62, 0.0  ;;  %v778_v61 = vld [vmem:[#allocation7 + $0x1] ss:$0 sm:$0xff] }
 0x220   :  { %v278_v0 = vsel %vm238_vm1, %v274_v63, -inf  ;;  %v275_v1 = vsel %vm238_vm1, %v273_v49, -inf }
 0x221   :  { %279 = vmax.xlane.f32.xlu0 %v278_v0  ;;  %276 = vmax.xlane.f32.xlu1 %v275_v1  ;;  %v570_v0 = vld [vmem:[#allocation8 + $0x228] sm:$0xff]  ;;  %v569_v1 = vld [vmem:[#allocation8 + $0x220] sm:$0xff] }
 0x222   :  { %583 = vmatprep.subr.mxu0 %v570_v0 }
 0x232   :  { %298 = vrot.lane.b32.xlu1 %v281_v4, %s1031_s30  ;;  %v566_v4 = vld [vmem:[#allocation8 + $0x208] sm:$0xff] }
 0x2aa   :  { %v280_v12 = vpop.xlane.xlu0 %279  ;;  %v277_v14 = vpop.xlane.xlu1 %276 }
 0x2ab   :  { %v293_v15 = vrot.slane %v280_v12, %v288_v11  ;;  %v289_v17 = vrot.slane %v277_v14, %v288_v11  ;;  %v563_v11 = vld [vmem:[#allocation8 + $0x1f0] sm:$0xff]  ;;  %v562_v12 = vld [vmem:[#allocation8 + $0x1e8] sm:$0xff]  ;;  %v561_v14 = vld [vmem:[#allocation8 + $0x1e0] sm:$0xff] }
 0x2ad   :  { %v295_v18 = vsel %vm294_vm3, %v293_v15, %v289_v17  ;;  %v560_v15 = vld [vmem:[#allocation8 + $0x1d8] sm:$0xff]  ;;  %v559_v17 = vld [vmem:[#allocation8 + $0x1d0] sm:$0xff] }
 0x2ae   :  { %v299_v19 = vpop.permute.xlu1 %298 }
 0x2af   :  { %v302_v20 = vsel %vm301_vm4, %v295_v18, %v299_v19  ;;  %v558_v18 = vld [vmem:[#allocation8 + $0x1c8] sm:$0xff]  ;;  %v557_v19 = vld [vmem:[#allocation8 + $0x1c0] sm:$0xff] }
 0x2b0   :  { %v304_v21 = vsel %vm303_vm5, %v302_v20, 0.0  ;;  %v556_v20 = vld [vmem:[#allocation8 + $0x1b8] sm:$0xff] }
 0x2b1   :  { %841 = vmatmul.mubr.msk.f32.vlgmr.msra.gmra.mxu0 %vm238_vm1, %v304_v21  ;;  %v555_v21 = vld [vmem:[#allocation8 + $0x1b0] sm:$0xff] }
 0x2b2   :  { %647 = vmatprep.mubr.f32.mxu0 %v1041_v3  ;;  %584 = vmatpush1.msra.mxu0 %v569_v1  ;;  %v567_v3 = vld [vmem:[#allocation8 + $0x210] sm:$0xff] }
 0x2b3   :  { %585 = vmatprep.subr.mxu0 %v568_v2 }
 0x2b4   :  { %586 = vmatpush1.msra.mxu0 %v567_v3 }
 0x2b5   :  { %587 = vmatprep.subr.mxu0 %v566_v4 }
 0x2b6   :  { %588 = vmatpush1.msra.mxu0 %v565_v5 }
 0x2b7   :  { %589 = vmatprep.subr.mxu0 %v564_v6 }
 0x2b8   :  { %590 = vmatpush1.msra.mxu0 %v563_v11 }
 0x2b9   :  { %591 = vmatprep.subr.mxu0 %v562_v12 }
 0x2ba   :  { %592 = vmatpush1.msra.mxu0 %v561_v14 }
 0x2bb   :  { %593 = vmatprep.subr.mxu0 %v560_v15 }
 0x2bc   :  { %594 = vmatpush1.msra.mxu0 %v559_v17 }
 0x2bd   :  { %595 = vmatprep.subr.mxu0 %v558_v18 }
 0x2be   :  { %596 = vmatpush1.msra.mxu0 %v557_v19 }
 0x2bf   :  { %597 = vmatprep.subr.mxu0 %v556_v20 }
 0x2c0   :  { %598 = vmatpush1.msra.mxu0 %v555_v21 }
 0x2c1   :  { %599 = vmatprep.subr.mxu0 %v554_v22 }
 0x2c2   :  { %600 = vmatpush1.msra.mxu0 %v553_v7 }
 0x2c3   :  { %601 = vmatprep.subr.mxu0 %v552_v8  ;;  %v779_v8 = vld [vmem:[#allocation7 + $0x2] ss:$0 sm:$0xff] }
 0x2c4   :  { %602 = vmatpush1.msra.mxu0 %v551_v23 }
 0x2c5   :  { %603 = vmatprep.subr.mxu0 %v550_v24  ;;  %v780_v24 = vld [vmem:[#allocation7 + $0x3] ss:$0 sm:$0xff] }
 0x2c6   :  { %604 = vmatpush1.msra.mxu0 %v549_v25 }
 0x2c7   :  { %605 = vmatprep.subr.mxu0 %v548_v26 }
 0x2c8   :  { %606 = vmatpush1.msra.mxu0 %v547_v27 }
 0x2c9   :  { %607 = vmatprep.subr.mxu0 %v546_v28  ;;  %v675_v28 = vld [vmem:[#allocation8 + $0x360] sm:$0xff] }
 0x2ca   :  { %608 = vmatpush1.msra.mxu0 %v545_v29  ;;  %v659_v29 = vld [vmem:[#allocation8 + $0x260] sm:$0xff] }
 0x2cb   :  { %609 = vmatprep.subr.mxu0 %v544_v30  ;;  %v674_v30 = vld [vmem:[#allocation8 + $0x350] sm:$0xff] }
 0x2cc   :  { %610 = vmatpush1.msra.mxu0 %v543_v31  ;;  %v658_v31 = vld [vmem:[#allocation8 + $0x250] sm:$0xff] }
 0x2cd   :  { %611 = vmatprep.subr.mxu0 %v542_v32  ;;  %v673_v32 = vld [vmem:[#allocation8 + $0x340] sm:$0xff] }
 0x2ce   :  { %612 = vmatpush1.msra.mxu0 %v541_v33  ;;  %v657_v33 = vld [vmem:[#allocation8 + $0x240] sm:$0xff] }
 0x2cf   :  { %613 = vmatprep.subr.mxu0 %v540_v34  ;;  %v672_v34 = vld [vmem:[#allocation8 + $0x330] sm:$0xff] }
 0x2d0   :  { %614 = vmatpush1.msra.mxu0 %v539_v35  ;;  %v656_v35 = vld [vmem:[#allocation8 + $0x230] sm:$0xff] }
 0x371   :  { %v376_v36 = vpop.f32.mrf.mxu0 }
 0x372   :  { %v381_v13 = vsel %vm380_vm6, %v376_v36, 0.0  ;;  %v389_v37 = vmul.f32 %v376_v36, %v376_v36 }
 0x373   :  { %v382_v16 = vrot.slane %v381_v13, 4  ;;  %v842_v38 = vpop.f32.mrf.mxu0 }
 0x374   :  { %v390_v39 = vsel %vm380_vm6, %v389_v37, 0.0  ;;  %v686_v37 = vld [vmem:[#allocation8 + $0x410] sm:$0xff]  ;;  %v685_v38 = vld [vmem:[#allocation8 + $0x400] sm:$0xff] }
 0x375   :  { %v383_v40 = vadd.f32 %v382_v16, %v381_v13  ;;  %v391_v41 = vrot.slane %v390_v39, 4  ;;  %v671_v13 = vld [vmem:[#allocation8 + $0x320] sm:$0xff]  ;;  %v670_v16 = vld [vmem:[#allocation8 + $0x310] sm:$0xff] }
 0x377   :  { %v384_v42 = vrot.slane %v383_v40, 2  ;;  %v392_v43 = vadd.f32 %v391_v41, %v390_v39  ;;  %v669_v39 = vld [vmem:[#allocation8 + $0x300] sm:$0xff]  ;;  %v668_v41 = vld [vmem:[#allocation8 + $0x2f0] sm:$0xff] }
 0x379   :  { %v385_v44 = vadd.f32 %v384_v42, %v383_v40  ;;  %v393_v45 = vrot.slane %v392_v43, 2  ;;  %v684_v40 = vld [vmem:[#allocation8 + $0x3f0] sm:$0xff]  ;;  %v683_v42 = vld [vmem:[#allocation8 + $0x3e0] sm:$0xff] }
 0x37b   :  { %v386_v46 = vrot.slane %v385_v44, 1  ;;  %v394_v47 = vadd.f32 %v393_v45, %v392_v43  ;;  %v667_v43 = vld [vmem:[#allocation8 + $0x2e0] sm:$0xff]  ;;  %v666_v45 = vld [vmem:[#allocation8 + $0x2d0] sm:$0xff] }
 0x37d   :  { %v387_v48 = vadd.f32 %v386_v46, %v385_v44  ;;  %v395_v50 = vrot.slane %v394_v47, 1  ;;  %v682_v44 = vld [vmem:[#allocation8 + $0x3d0] sm:$0xff]  ;;  %v681_v46 = vld [vmem:[#allocation8 + $0x3c0] sm:$0xff] }
 0x37f   :  { %v388_v51 = vmul.f32 0.5, %v387_v48  ;;  %v396_v52 = vadd.f32 %v395_v50, %v394_v47  ;;  %v665_v47 = vld [vmem:[#allocation8 + $0x2c0] sm:$0xff]  ;;  %v680_v48 = vld [vmem:[#allocation8 + $0x3b0] sm:$0xff] }
 0x380   :  { %v664_v50 = vld [vmem:[#allocation8 + $0x2b0] sm:$0xff] }
 0x381   :  { %v397_v53 = vmul.f32 0.5, %v396_v52  ;;  %v398_v54 = vmul.f32 %v388_v51, %v388_v51  ;;  %v400_v57 = vsub.f32 %v376_v36, %v388_v51  ;;  %v687_v36 = vld [vmem:[#allocation8 + $0x420] sm:$0xff] }
 0x382   :  { %801 = vmatprep.subr.mxu1 %v687_v36  ;;  %v679_v51 = vld [vmem:[#allocation8 + $0x3a0] sm:$0xff] }
 0x383   :  { %v399_v55 = vsub.f32 %v397_v53, %v398_v54  ;;  %v663_v52 = vld [vmem:[#allocation8 + $0x2a0] sm:$0xff]  ;;  %v678_v53 = vld [vmem:[#allocation8 + $0x390] sm:$0xff] }
 0x384   :  { %v662_v54 = vld [vmem:[#allocation8 + $0x290] sm:$0xff]  ;;  %v571_v36 = vld [vmem:[#allocation8] ss:$8 sm:$0x3] }
 0x385   :  { %v401_v56 = vadd.f32 1e-05, %v399_v55  ;;  %v677_v55 = vld [vmem:[#allocation8 + $0x380] sm:$0xff] }
 0x387   :  { %913 = vrsqrt.f32 %v401_v56  ;;  %v661_v56 = vld [vmem:[#allocation8 + $0x280] sm:$0xff] }
 0x394   :  { %v914_v58 = vpop.eup %913 }
 0x395   :  { %v403_v60 = vmul.f32 %v914_v58, %v400_v57  ;;  %v676_v57 = vld [vmem:[#allocation8 + $0x370] sm:$0xff] }
 0x396   :  { %v660_v58 = vld [vmem:[#allocation8 + $0x270] sm:$0xff] }
 0x397   :  { %v409_v62 = vmul.f32 %v777_v59, %v403_v60 }
 0x399   :  { %v415_v49 = vadd.f32 %v778_v61, %v409_v62 }
 0x39b   :  { %v416_v63 = vmax.f32 %v415_v49, 0.0 }
 0x39d   :  { %876 = vmatmul.mubr.f32.vlgmr.msra.gmra.mxu1 %v416_v63 }
 0x39e   :  { %802 = vmatpush3.msra.mxu1 %v671_v13  ;;  %v576_v13 = vrot.slane %v571_v36, %v1088_v9 }
 0x39f   :  { %803 = vmatprep.subr.mxu1 %v686_v37  ;;  %v580_v37 = vrot.slane %v571_v36, %v1091_v10 }
 0x3a0   :  { %804 = vmatpush3.msra.mxu1 %v670_v16 }
 0x3a1   :  { %805 = vmatprep.subr.mxu1 %v685_v38 }
 0x3a2   :  { %806 = vmatpush3.msra.mxu1 %v669_v39 }
 0x3a3   :  { %807 = vmatprep.subr.mxu1 %v684_v40 }
 0x3a4   :  { %808 = vmatpush3.msra.mxu1 %v668_v41 }
 0x3a5   :  { %809 = vmatprep.subr.mxu1 %v683_v42 }
 0x3a6   :  { %810 = vmatpush3.msra.mxu1 %v667_v43 }
 0x3a7   :  { %811 = vmatprep.subr.mxu1 %v682_v44 }
 0x3a8   :  { %812 = vmatpush3.msra.mxu1 %v666_v45 }
 0x3a9   :  { %813 = vmatprep.subr.mxu1 %v681_v46 }
 0x3aa   :  { %814 = vmatpush3.msra.mxu1 %v665_v47 }
 0x3ab   :  { %815 = vmatprep.subr.mxu1 %v680_v48 }
 0x3ac   :  { %816 = vmatpush3.msra.mxu1 %v664_v50 }
 0x3ad   :  { %817 = vmatprep.subr.mxu1 %v679_v51 }
 0x3ae   :  { %818 = vmatpush3.msra.mxu1 %v663_v52 }
 0x3af   :  { %819 = vmatprep.subr.mxu1 %v678_v53 }
 0x3b0   :  { %820 = vmatpush3.msra.mxu1 %v662_v54 }
 0x3b1   :  { %821 = vmatprep.subr.mxu1 %v677_v55 }
 0x3b2   :  { %822 = vmatpush3.msra.mxu1 %v661_v56 }
 0x3b3   :  { %823 = vmatprep.subr.mxu1 %v676_v57 }
 0x3b4   :  { %824 = vmatpush3.msra.mxu1 %v660_v58 }
 0x3b5   :  { %825 = vmatprep.subr.mxu1 %v675_v28 }
 0x3b6   :  { %826 = vmatpush3.msra.mxu1 %v659_v29 }
 0x3b7   :  { %827 = vmatprep.subr.mxu1 %v674_v30 }
 0x3b8   :  { %828 = vmatpush3.msra.mxu1 %v658_v31 }
 0x3b9   :  { %829 = vmatprep.subr.mxu1 %v673_v32 }
 0x3ba   :  { %830 = vmatpush3.msra.mxu1 %v657_v33 }
 0x3bb   :  { %831 = vmatprep.subr.mxu1 %v672_v34 }
 0x3bc   :  { %832 = vmatpush3.msra.mxu1 %v656_v35 }
 0x45d   :  { %v499_v59 = vpop.f32.mrf.mxu1 }
 0x45e   :  { %v503_v60 = vsel %vm380_vm6, %v499_v59, 0.0  ;;  %v511_v61 = vmul.f32 %v499_v59, %v499_v59 }
 0x45f   :  { %v504_v62 = vrot.slane %v503_v60, 4  ;;  %v877_v49 = vpop.f32.mrf.mxu1 }
 0x460   :  { %v512_v63 = vsel %vm380_vm6, %v511_v61, 0.0 }
 0x461   :  { %v505_v0 = vadd.f32 %v504_v62, %v503_v60  ;;  %v513_v1 = vrot.slane %v512_v63, 4 }
 0x463   :  { %v506_v2 = vrot.slane %v505_v0, 2  ;;  %v514_v3 = vadd.f32 %v513_v1, %v512_v63 }
 0x465   :  { %v507_v4 = vadd.f32 %v506_v2, %v505_v0  ;;  %v515_v5 = vrot.slane %v514_v3, 2 }
 0x467   :  { %v508_v6 = vrot.slane %v507_v4, 1  ;;  %v516_v11 = vadd.f32 %v515_v5, %v514_v3 }
 0x469   :  { %v509_v12 = vadd.f32 %v508_v6, %v507_v4  ;;  %v517_v14 = vrot.slane %v516_v11, 1 }
 0x46b   :  { %v510_v15 = vmul.f32 0.5, %v509_v12  ;;  %v518_v17 = vadd.f32 %v517_v14, %v516_v11 }
 0x46d   :  { %v519_v18 = vmul.f32 0.5, %v518_v17  ;;  %v520_v19 = vmul.f32 %v510_v15, %v510_v15  ;;  %v522_v22 = vsub.f32 %v499_v59, %v510_v15 }
 0x46f   :  { %v521_v20 = vsub.f32 %v519_v18, %v520_v19 }
 0x471   :  { %v523_v21 = vadd.f32 1e-05, %v521_v20 }
 0x473   :  { %915 = vrsqrt.f32 %v523_v21 }
 0x480   :  { %v916_v7 = vpop.eup %915 }
 0x481   :  { %v525_v23 = vmul.f32 %v916_v7, %v522_v22 }
 0x483   :  { %v531_v25 = vmul.f32 %v779_v8, %v525_v23 }
 0x485   :  { %v537_v26 = vadd.f32 %v780_v24, %v531_v25 }
 0x487   :  { %v538_v27 = vmax.f32 %v537_v26, 0.0 }
 0x489   :  { %648 = vmatmul.mubr.f32.vlgmr.msra.gmra.mxu0 %v538_v27 }
 0x549   :  { %v649_v16 = vpop.f32.mrf.mxu0 }
 0x54a   :  { %v650_v38 = vadd.f32 %v649_v16, %v576_v13 }
 0x54b   :  { %v651_v39 = vpop.f32.mrf.mxu0 }
 0x54c   :  { %v652_v40 = vadd.f32 %v651_v39, %v580_v37  ;;  %v654_v42 = vmax.f32 %v650_v38, 0.0 }
 0x54e   :  { %v655_v41 = vmax.f32 %v652_v40, 0.0 }
 0x550   :  { %752 = vmatprep.mubr.f32.mxu1 %v655_v41 }
 0x551   :  { %753 = vmatmul.mubr.f32.vlgmr.msra.gmra.mxu1 %v654_v42 }
 0x611   :  { %v833_v43 = vpop.f32.mrf.mxu1 }
 0x613   :  { %v834_v44 = vpop.f32.mrf.mxu1 }
 0x614   :  { %v835_v45 = vadd.f32 %v834_v44, %v833_v43 }
 0x616   :  { %758 = vst [vmem:[#allocation10] sm:$0x3] %v835_v45 }
 0x617   :  { %1008 = shalt.err (!%p1005_p10)
}
 0x618   :  { %768 = dma.vmem_to_hbm [thread:$0]  %s766_s3, 32, %s1169_s4, [#allocation4]  }
 0x619   :  { %1023 = dma.done.wait [#allocation4], 32  }
 0x61a   :  { %1024 = vsyncadd [#allocation4], 4294967264 }
 0x61b   :  { %772 = vsyncpa [#allocation3], 1 }
 0x61c   :  { %773 = vsyncpa [#allocation6], 1 }
 0x61d   :  { %774 = vsyncpa [#allocation9], 1 }
 0x61e   :  { %775 = vsyncpa [#allocation4], 1 }

</bundles_post_ra>
